<compile_context>
chip_gen: v7x
topology: tpu7x:2x2x1
jax: 0.10.0
libtpu: 0.0.40
codegen_flags: <defaults>
</compile_context>

<pallas_src>
import jax
import jax.numpy as jnp
from jax import lax
from jax.experimental import pallas as pl
from jax.experimental.pallas import tpu as pltpu

_MIB = 1024 * 1024


def _crop_resize_matrix(out_size: int, full_size: int, crop_size, offset):
    """(out_size, full_size) f32 matrix that crops [offset, offset+crop_size)
    along one axis and bilinearly resizes it to out_size (align_corners=False,
    matching torchvision Resize; antialias is a no-op for upsampling, which is
    always the case here since the crop is >= 3/4 of the full extent).
    crop_size / offset may be traced scalars."""
    crop_size = jnp.asarray(crop_size, jnp.int32)
    offset = jnp.asarray(offset, jnp.int32)
    o = jnp.arange(out_size, dtype=jnp.float32)
    scale = crop_size.astype(jnp.float32) / float(out_size)
    src = (o + 0.5) * scale - 0.5
    i0 = jnp.floor(src)
    frac = src - i0
    i0 = i0.astype(jnp.int32)
    i0c = jnp.clip(i0, 0, crop_size - 1)
    i1c = jnp.clip(i0 + 1, 0, crop_size - 1)
    cols = jnp.arange(full_size, dtype=jnp.int32)[None, :]          # (1, full)
    w = ((1.0 - frac)[:, None] * (cols == (offset + i0c)[:, None]).astype(jnp.float32)
         + frac[:, None] * (cols == (offset + i1c)[:, None]).astype(jnp.float32))
    return w                                                         # (out, full)


def _draw_crop_params(key, U: int, T: int):
    """Same distributions as the PyTorch module: t ~ U[3T/4, T), f ~ U[3U/4, U),
    top ~ U[0, U-f], left ~ U[0, T-t]."""
    k_t, k_f, k_top, k_left = jax.random.split(key, 4)
    t = jax.random.randint(k_t, (), 3 * T // 4, T, dtype=jnp.int32)
    f = jax.random.randint(k_f, (), 3 * U // 4, U, dtype=jnp.int32)
    top = jax.random.randint(k_top, (), 0, U - f + 1, dtype=jnp.int32)
    left = jax.random.randint(k_left, (), 0, T - t + 1, dtype=jnp.int32)
    return f, t, top, left


# ----------------------------------------------------------------------------- kernel
def _resize_kernel(x_ref, wr_ref, wct_ref, out_ref):
    # x_ref:   (bcb, U_p, T_p) input dtype  (full time axis, resident across j)
    # wr_ref:  (U_p, U_p) bf16  row (frequency) crop+resize matrix
    # wct_ref: (T_p, tn)  bf16  column (time) crop+resize matrix tile (transposed)
    # out_ref: (bcb, U_p, tn)  input dtype
    bcb = out_ref.shape[0]
    wr = wr_ref[...]
    wct = wct_ref[...]

    def body(b, carry):
        # One plane of temporaries at a time: no bcb-way weight broadcast and no
        # full-block f32 intermediates (frees VMEM for a larger bcb block).
        xb = x_ref[b].astype(jnp.bfloat16)                               # (U_p, T_p)
        # Time (column) resize: flat 2-D MXU GEMM, f32 accumulation.
        zb = jnp.dot(xb, wct, preferred_element_type=jnp.float32)        # (U_p, tn)
        # Frequency (row) resize: flat 2-D MXU GEMM, f32 accumulation.
        # (2-tap convex rows -> bf16 re-quantization of zb is benign.)
        yb = jnp.dot(wr, zb.astype(jnp.bfloat16),
                     preferred_element_type=jnp.float32)                 # (U_p, tn)
        out_ref[b] = yb.astype(out_ref.dtype)
        return carry

    lax.fori_loop(0, bcb, body, 0)


# ----------------------------------------------------------------------------- tiling
def _tpu_vmem_and_cores():
    try:
        vmem = int(pltpu.get_tpu_info().vmem_capacity_bytes)
    except Exception:
        vmem = 64 * _MIB                       # conservative (v7x-sized) default
    # v7x: 64 MiB VMEM, 2 TensorCores/chip.  v5e/v6e: 128 MiB VMEM, 1 TC.
    n_tc = 2 if vmem <= 64 * _MIB else 1
    return vmem, n_tc


def _choose_tiles(BC, U_p, T_p, itemsize, vmem_cap, n_tc):
    # Time tile: bound the (T_p, tn) weight tile / (bcb, U_p, tn) output block
    # for long spectrograms; a single tile for T_p <= 1024.
    if T_p <= 1024:
        tn = T_p
    else:
        tn = 128
        for d in range(256, 513, 128):
            if T_p % d == 0:
                tn = d
    # Generation-aware block budget: ~24 MiB on v7x (64 MiB VMEM),
    # ~48 MiB on v5e/v6e (128 MiB VMEM).
    budget = 24 * _MIB if vmem_cap <= 64 * _MIB else 48 * _MIB
    # Fixed VMEM: double-buffered bf16 weight blocks + ~2 planes of live
    # in-kernel temporaries (~8 B/elem over (U_p, T_p)).
    fixed = 2 * 2 * (U_p * U_p + T_p * tn) + 2 * 8 * U_p * T_p
    # Per-plane VMEM: double-buffered input block row + output block row.
    per_plane = 2 * U_p * (T_p + tn) * itemsize
    bcb = max(1, min(BC, (budget - fixed) // per_plane))
    while BC % bcb:
        bcb -= 1
    if n_tc >= 2:
        steps = BC // bcb
        if steps < 2 or steps % 2:
            # Prefer an EVEN number of BC-grid steps so both v7x TensorCores get
            # balanced work; keep the current choice if no even split exists.
            cands = [d for d in range(1, bcb + 1)
                     if BC % d == 0 and (BC // d) % 2 == 0]
            if cands:
                bcb = max(cands)
    # On single-TC parts (v5e/v6e) a single grid step is allowed: no forced split.
    est_vmem = fixed + per_plane * bcb
    return bcb, tn, est_vmem


def _pallas_resize(x3d, w_row, w_col_t):
    BC, U_p, T_p = x3d.shape
    vmem_cap, n_tc = _tpu_vmem_and_cores()
    bcb, tn, est = _choose_tiles(BC, U_p, T_p, x3d.dtype.itemsize, vmem_cap, n_tc)
    grid = (BC // bcb, T_p // tn)
    vmem_limit = int(max(32 * _MIB, min(0.75 * vmem_cap, est + 8 * _MIB)))
    return pl.pallas_call(
        _resize_kernel,
        out_shape=jax.ShapeDtypeStruct((BC, U_p, T_p), x3d.dtype),
        grid_spec=pltpu.PrefetchScalarGridSpec(
            num_scalar_prefetch=0,
            grid=grid,
            in_specs=[
                # Full-time-axis input block; index_map constant in j, so the
                # block is fetched once per i and stays resident across time tiles.
                pl.BlockSpec((bcb, U_p, T_p), lambda i, j: (i, 0, 0)),
                # TODO(synk): single-buffer these constant weight blocks
                # (pipeline_mode=pl.Buffered(1)) once verified safe everywhere;
                # after time-tiling they are small, so left default here.
                pl.BlockSpec((U_p, U_p), lambda i, j: (0, 0)),
                pl.BlockSpec((T_p, tn), lambda i, j: (0, j)),
            ],
            out_specs=pl.BlockSpec((bcb, U_p, tn), lambda i, j: (i, 0, j)),
        ),
        compiler_params=pltpu.CompilerParams(
            dimension_semantics=("parallel", "arbitrary"),
            vmem_limit_bytes=vmem_limit,
        ),
    )(x3d, w_row, w_col_t)


# ----------------------------------------------------------------------------- wrapper
def _ceil_to(x: int, m: int) -> int:
    return (x + m - 1) // m * m


@jax.jit
def my_rrc_forward(specgram, key):
    """Random crop to (f, t) with f in [3U/4, U), t in [3T/4, T), then bilinear
    resize back to (U, T).  Mirrors my_RRC.forward; the crop is folded into the
    bilinear weight matrices so all shapes stay fixed (single compilation)."""
    B, C, U, T = specgram.shape
    f, t, top, left = _draw_crop_params(key, U, T)
    # Pad U to the bf16 sublane tile (16) and T to a lane multiple (128): MXU
    # passes stay tile-aligned and output stores lane-dense.  The crop-resize
    # matrices are zero-padded so the padding never changes the math.
    U_p = _ceil_to(U, 16)
    T_p = _ceil_to(T, 128)
    w_row = _crop_resize_matrix(U, U, f, top)                          # (U, U)
    w_col_t = _crop_resize_matrix(T, T, t, left).T                     # (T, T)
    w_row = jnp.pad(w_row, ((0, U_p - U), (0, U_p - U))).astype(jnp.bfloat16)
    w_col_t = jnp.pad(w_col_t, ((0, T_p - T), (0, T_p - T))).astype(jnp.bfloat16)
    x3d = specgram.reshape(B * C, U, T)
    if (U_p, T_p) != (U, T):
        x3d = jnp.pad(x3d, ((0, 0), (0, U_p - U), (0, T_p - T)))
    out = _pallas_resize(x3d, w_row, w_col_t)                          # (BC, U_p, T_p)
    if (U_p, T_p) != (U, T):
        out = out[:, :U, :T]
    return out.reshape(B, C, U, T)


# ----------------------------------------------------------------------------- demo
if __name__ == "__main__":
    key = jax.random.PRNGKey(0)
    k_data, k_rrc = jax.random.split(key)

    B, C, U, T = 2, 4, 16, 16
    x = jax.random.normal(k_data, (B, C, U, T), dtype=jnp.float32)

    out = jax.block_until_ready(my_rrc_forward(x, k_rrc))
    assert out.shape == (B, C, U, T), out.shape
    assert out.dtype == x.dtype, out.dtype

    # Second call with a different key: same shapes -> reuses the compilation.
    out2 = jax.block_until_ready(my_rrc_forward(x, jax.random.PRNGKey(7)))
    assert out2.shape == (B, C, U, T)

    # Reference: explicit crop -> bilinear resize in pure JAX f32 (the PyTorch
    # RandomCrop + Resize semantics), using the same crop parameters.
    f, t, top, left = _draw_crop_params(k_rrc, U, T)
    fi, ti, topi, lefti = int(f), int(t), int(top), int(left)
    crop = x[:, :, topi:topi + fi, lefti:lefti + ti].astype(jnp.float32)
    wr_plain = _crop_resize_matrix(U, fi, fi, 0)      # (U, fi)
    wc_plain = _crop_resize_matrix(T, ti, ti, 0)      # (T, ti)
    ref = jnp.einsum("uf,bcft,xt->bcux", wr_plain, crop, wc_plain)
    # bf16 MXU inputs (f32 accumulation) -> loosened tolerance vs f32 reference.
    ok = jnp.allclose(out.astype(jnp.float32), ref, atol=5e-2, rtol=5e-2)
    assert bool(ok), f"max abs err = {float(jnp.max(jnp.abs(out - ref)))}"

    print("KERNEL_OK")
</pallas_src>

<mosaic_0001>
module attributes {stable_mosaic.version = 11 : i64} {
  func.func @_resize_kernel(%arg0: i32, %arg1: i32, %arg2: memref<4x16x128xf32, #tpu.memory_space<vmem>>, %arg3: memref<16x16xbf16, #tpu.memory_space<vmem>>, %arg4: memref<128x128xbf16, #tpu.memory_space<vmem>>, %arg5: memref<4x16x128xf32, #tpu.memory_space<vmem>>) attributes {dimension_semantics = [#tpu.dimension_semantics<parallel>, #tpu.dimension_semantics<arbitrary>], iteration_bounds = array<i64: 2, 1>, scalar_prefetch = 0 : i64, scratch_operands = 0 : i64, tpu.core_type = #tpu.core_type<tc>, window_params = [{transform_indices = @transform_0, window_bounds = array<i64: 4, 16, 128>}, {pipeline_mode = #tpu.pipeline_mode<synchronous>, transform_indices = @transform_1, window_bounds = array<i64: 16, 16>}, {transform_indices = @transform_2, window_bounds = array<i64: 128, 128>}, {transform_indices = @transform_3, window_bounds = array<i64: 4, 16, 128>}]} {
    %c0 = arith.constant 0 : index
    %c0_0 = arith.constant 0 : index
    %0 = vector.load %arg3[%c0, %c0_0] : memref<16x16xbf16, #tpu.memory_space<vmem>>, vector<16x16xbf16>
    %c0_1 = arith.constant 0 : index
    %c0_2 = arith.constant 0 : index
    %1 = vector.load %arg4[%c0_1, %c0_2] : memref<128x128xbf16, #tpu.memory_space<vmem>>, vector<128x128xbf16>
    %c0_i32 = arith.constant 0 : i32
    %c4_i32 = arith.constant 4 : i32
    %2 = arith.addi %c0_i32, %c4_i32 : i32
    %c1_i32 = arith.constant 1 : i32
    scf.for %arg6 = %c0_i32 to %2 step %c1_i32  : i32 {
      %3 = arith.index_cast %arg6 : i32 to index
      %c0_4 = arith.constant 0 : index
      %c0_5 = arith.constant 0 : index
      %4 = vector.load %arg2[%3, %c0_4, %c0_5] : memref<4x16x128xf32, #tpu.memory_space<vmem>>, vector<1x16x128xf32>
      %5 = vector.shape_cast %4 : vector<1x16x128xf32> to vector<16x128xf32>
      %6 = arith.truncf %5 : vector<16x128xf32> to vector<16x128xbf16>
      %cst = arith.constant dense<0.000000e+00> : vector<16x128xf32>
      %7 = tpu.matmul %6, %1, %cst {dimension_numbers = #tpu.dot_dimension_numbers<[1], [0], [0], [1], [0, 0, 1, 1], [], []>} : vector<16x128xbf16>, vector<128x128xbf16>, vector<16x128xf32> -> vector<16x128xf32>
      %8 = arith.truncf %7 : vector<16x128xf32> to vector<16x128xbf16>
      %cst_6 = arith.constant dense<0.000000e+00> : vector<16x128xf32>
      %9 = tpu.matmul %0, %8, %cst_6 {dimension_numbers = #tpu.dot_dimension_numbers<[1], [0], [0], [1], [0, 0, 1, 1], [], []>} : vector<16x16xbf16>, vector<16x128xbf16>, vector<16x128xf32> -> vector<16x128xf32>
      %10 = arith.index_cast %arg6 : i32 to index
      %c0_7 = arith.constant 0 : index
      %c0_8 = arith.constant 0 : index
      %11 = vector.load %arg5[%10, %c0_7, %c0_8] : memref<4x16x128xf32, #tpu.memory_space<vmem>>, vector<1x16x128xf32>
      %12 = vector.shape_cast %11 : vector<1x16x128xf32> to vector<16x128xf32>
      %13 = vector.shape_cast %9 : vector<16x128xf32> to vector<1x16x128xf32>
      tpu.vector_store %arg5[%10, %c0_7, %c0_8], %13 {strides = array<i32>} : memref<4x16x128xf32, #tpu.memory_space<vmem>>, vector<1x16x128xf32>,
    }
    %c4_i32_3 = arith.constant 4 : i32
    return
  }
  func.func @transform_0(%arg0: i32, %arg1: i32) -> (i32, i32, i32) {
    %c0_i32 = arith.constant 0 : i32
    %c0_i32_0 = arith.constant 0 : i32
    %c0_i32_1 = arith.constant 0 : i32
    return %arg0, %c0_i32, %c0_i32_0 : i32, i32, i32
  }
  func.func @transform_1(%arg0: i32, %arg1: i32) -> (i32, i32) {
    %c0_i32 = arith.constant 0 : i32
    %c0_i32_0 = arith.constant 0 : i32
    %c0_i32_1 = arith.constant 0 : i32
    return %c0_i32, %c0_i32_0 : i32, i32
  }
  func.func @transform_2(%arg0: i32, %arg1: i32) -> (i32, i32) {
    %c0_i32 = arith.constant 0 : i32
    %c0_i32_0 = arith.constant 0 : i32
    return %c0_i32, %arg1 : i32, i32
  }
  func.func @transform_3(%arg0: i32, %arg1: i32) -> (i32, i32, i32) {
    %c0_i32 = arith.constant 0 : i32
    %c0_i32_0 = arith.constant 0 : i32
    return %arg0, %c0_i32, %arg1 : i32, i32, i32
  }
}

</mosaic_0001>

<bundles_post_ra>
// kernel: my_rrc_forward.1
= control target key start
LH: loop header
LB: loop body
LE: loop exit
PB: predicated region body
PF: predicated region fallthrough
CT: control target
= control target key end

     0   :  { %8 = vsyncpa [#allocation3], 0  ;;  %s974_s0 = inlined_call_operand.vmem [shape: f32[8,16,128], index: 0, kind: input, shape index: {}]   ;;  %s975_s1 = inlined_call_operand.vmem [shape: bf16[16,16], index: 1, kind: input, shape index: {}]   ;;  %s976_s2 = inlined_call_operand.vmem [shape: bf16[128,128], index: 2, kind: input, shape index: {}]   ;;  %s977_s3 = inlined_call_operand.hbm [shape: f32[8,16,128], index: 3, kind: output, shape index: {}]  }
   0x1   :  { %10 = vsyncpa [#allocation3 + $0x1], 0  ;;  %s738_s12 = smov 0   ;;  %s740_s13 = smov 0  }
   0x2   :  { %s742_s14 = smov 0   ;;  %s744_s15 = smov 0  }
   0x3   :  { %s746_s16 = smov 0   ;;  %s748_s17 = smov 0  }
   0x4 LB: > { %s491_s18 = sadd.s32 4294967295, %s707_s17   ;;  %s492_s19 = sadd.s32 4294967294, %s707_s17   ;;  %s707_s17 = sphi %s748_s17, %s16_s17   ;;  %s703_s16 = sphi %s746_s16, %s984_s16   ;;  %s699_s15 = sphi %s744_s15, %s983_s15   ;;  %s695_s14 = sphi %s742_s14, %s982_s14   ;;  %s691_s13 = sphi %s740_s13, %s981_s13   ;;  %s687_s12 = sphi %s738_s12, %s980_s12  }
   0x5   : > { %s28_s20 = sadd.s32 1, %s703_s16  ;;  %s110_s21 = sadd.s32 1, %s695_s14 }
   0x6   : > { %p30_p0 = scmp.ge.s32.totalorder %s28_s20, 2  ;;  %p120_p1 = scmp.ne.s32.totalorder %s695_s14, %s691_s13 }
   0x7   : > { %p121_p2 = scmp.eq.s32.totalorder %s491_s18, 1  ;;  %p126_p3 = scmp.ne.s32.totalorder %s691_s13, %s687_s12 }
   0x8   : > { %s986_s20 = smov (%p30_p0, %s28_s20), 0  ;;  %p127_p5 = scmp.eq.s32.totalorder %s492_s19, 1 }
   0x9   : > { %p778_p4 = por %p121_p2, %p120_p1  ;;  %s105_s23 = ssub.s32 %s703_s16, %s986_s20 }
   0xa   : > { %p496_p6 = scmp.ge.s32.totalorder %s707_s17, 1  ;;  %p108_p7 = scmp.eq.s32.totalorder %s105_s23, 0 }
   0xb   : > { %p785_p8 = por %p127_p5, %p126_p3  ;;  %p165_p9 = scmp.lt.s32.totalorder %s707_s17, 3 }
   0xc   : > { %s791_s25 = scalar_select %p108_p7, %s695_s14, %s110_s21  }
   0xd   : > { %p166_p10 = pnand %p496_p6, %p165_p9 }
   0xe   : > { %s191_s26 = sand.u32 (!%p166_p10), 1, %s691_s13   ;;  %s498_s27 = sshll.u32 (!%p166_p10), %s699_s15, 2  ;;  %v798_v0 = vld [vmem:[%s975_s1] sm:$0xf] (!%p166_p10)  ;;  %v803_v1 = vld [vmem:[%s975_s1 + $0x4] sm:$0xf] (!%p166_p10) }
   0xf   : > { %169 = sbr.rel (%p166_p10) target bundleno = 506 (0x1fa), region = 32  ;;  %s807_s5 = sshll.u32 (!%p166_p10), %s191_s26, 6  ;;  %v812_v2 = vld [vmem:[%s976_s2] sm:$0xf] (!%p166_p10)  ;;  %v817_v3 = vld [vmem:[%s976_s2 + $0x4] sm:$0xf] (!%p166_p10) }
  0x10   : > { %p195_p11 = scmp.lt.s32.totalorder (!%p166_p10), %s498_s27, 7  ;;  %v822_v4 = vld [vmem:[%s976_s2 + $0x8] sm:$0xf] (!%p166_p10)  ;;  %v827_v5 = vld [vmem:[%s976_s2 + $0xc] sm:$0xf] (!%p166_p10)  ;;  %s193_s19 = scalar_lea.vmem (!%p166_p10), [#allocation2], %s807_s5 }
  0x11   : > { %v832_v6 = vld [vmem:[%s976_s2 + $0x10] sm:$0xf] (!%p166_p10)  ;;  %v837_v7 = vld [vmem:[%s976_s2 + $0x14] sm:$0xf] (!%p166_p10)  ;;  %v842_v8 = vld [vmem:[%s976_s2 + $0x18] sm:$0xf] (!%p166_p10) }
  0x12   : > { %v847_v9 = vld [vmem:[%s976_s2 + $0x1c] sm:$0xf] (!%p166_p10)  ;;  %v852_v10 = vld [vmem:[%s976_s2 + $0x20] sm:$0xf] (!%p166_p10)  ;;  %v857_v11 = vld [vmem:[%s976_s2 + $0x24] sm:$0xf] (!%p166_p10) }
  0x13   : > { %v862_v12 = vld [vmem:[%s976_s2 + $0x28] sm:$0xf] (!%p166_p10)  ;;  %v872_v13 = vld [vmem:[%s976_s2 + $0x2c] sm:$0xf] (!%p166_p10)  ;;  %v877_v14 = vld [vmem:[%s976_s2 + $0x30] sm:$0xf] (!%p166_p10) }
  0x14   : > { %v222_v15 = vld [vmem:[%s976_s2 + $0x34] sm:$0xf] (!%p166_p10)  ;;  %v223_v16 = vld [vmem:[%s976_s2 + $0x38] sm:$0xf] (!%p166_p10)  ;;  %v224_v17 = vld [vmem:[%s976_s2 + $0x3c] sm:$0xf] (!%p166_p10) }
  0x15   : > { %s889_s21 = smov (!%p166_p10), 0  }
  0x16   : > { %s988_s27 = smov (!%p195_p11, %s498_s27), 7 }
  0x17   : > { %s518_s10 = sshll.u32 %s988_s27, 4 }
  0x18   : > { %s867_s29 = scalar_lea.vmem %s974_s0, %s518_s10 }
  0x19 LB: >> { %v502_v18 = vcombine.low %v812_v2, %v817_v3  ;;  %v713_v19 = vmov 0.0   ;;  %v503_v20 = vcombine.low %v822_v4, %v827_v5  ;;  %vm714_vm0 = vmmov 0   ;;  %s501_s23 = sshll.u32 %s711_s21, 4  ;;  %s230_s21 = sadd.s32 1, %s711_s21   ;;  %s711_s21 = sphi %s889_s21, %s230_s21  }
  0x1a   : >> { %532 = vmatprep.subr.bf16.mxu0 %v713_v19  ;;  %552 = vmatprep.subr.bf16.mxu1 %v713_v19  ;;  %v504_v21 = vcombine.low %v832_v6, %v837_v7  ;;  %v505_v22 = vcombine.low %v842_v8, %v847_v9  ;;  %v506_v23 = vcombine.low %v852_v10, %v857_v11  ;;  %s232_s28 = scalar_lea.vmem %s867_s29, %s501_s23  ;;  %vm331_vm1 = vcmask 130048   ;;  %s376_s30 = scalar_lea.vmem %s193_s19, %s501_s23 [#allocation2] }
  0x1b   : >> { %533 = vmatpush3.bf16.msra.mxu0 %v502_v18  ;;  %548 = vmatprep.mubr.msk.bf16.mxu0 %vm714_vm0, %v713_v19  ;;  %v507_v24 = vcombine.low %v862_v12, %v872_v13  ;;  %v508_v25 = vcombine.low %v877_v14, %v222_v15  ;;  %v509_v26 = vcombine.low %v223_v16, %v224_v17  ;;  %v233_v27 = vld [vmem:[%s232_s28] sm:$0xff]  ;;  %v234_v28 = vld [vmem:[%s232_s28 + $0x8] sm:$0xff]  ;;  %p227_p12 = scmp.ge.s32.totalorder %s230_s21, 4  }
  0x1c   : >> { %534 = vmatprep.subr.bf16.mxu0 %v713_v19  ;;  %554 = vmatprep.mubr.msk.bf16.mxu1 %vm714_vm0, %v713_v19  ;;  %v235_v29 = vpack.c.bf16 %v234_v28, %v233_v27  ;;  %v510_v35 = vcombine.low %v798_v0, %v803_v1  ;;  %s520_s4 = sshll.u32 (%p227_p12), %s699_s15, 10  ;;  %s395_s8 = sshll.u32 (%p227_p12), %s193_s19, 4  ;;  %s924_s8 = int_to_ptr.vmem [resolvable:$true] %s395_s8 }
  0x1d   : > { %s920_s7 = scalar_lea.hbm (%p227_p12), %s977_s3, %s520_s4  ;;  %s928_s9 = scalar_lea.sflag (%p227_p12), [#allocation3], %s191_s26 }
  0x1e   : > { %s625_s29 = scalar_lea.vmem (%p227_p12), %s924_s8, 1024  ;;  %s715_s15 = smov (%p227_p12), [#allocation2]  }
  0x1f   : >> { %535 = vmatpush3.bf16.msra.mxu0 %v503_v20  ;;  %p626_p13 = scmp.ne.s32.totalorder (%p227_p12), %s924_s8, %s625_s29  ;;  %s629_s11 = sshll.u32 (%p227_p12), %s715_s15, 4  ;;  %s630_s11 = int_to_ptr.vmem [resolvable:$false] %s629_s11 }
  0x20   : >> { %536 = vmatprep.subr.bf16.mxu0 %v713_v19  ;;  %s631_s10 = scalar_lea.vmem (%p227_p12), %s630_s11, 2048  ;;  %p632_p2 = scmp.lt.s32.totalorder (%p227_p12), %s924_s8, %s630_s11 }
  0x21   : > { %p627_p0 = pnand (%p227_p12), %p626_p13, %p778_p4  ;;  %p633_p3 = scmp.lt.s32.totalorder (%p227_p12), %s631_s10, %s625_s29 }
  0x23   : >> { %537 = vmatpush3.bf16.msra.mxu0 %v504_v21  ;;  %p628_p1 = pneg (%p227_p12), %p627_p0  ;;  %p634_p5 = por (%p227_p12), %p633_p3, %p632_p2 }
  0x24   : >> { %538 = vmatprep.subr.bf16.mxu0 %v713_v19 }
  0x25   : > { %p635_p6 = pnand (%p227_p12), %p634_p5, %p628_p1 }
  0x27   : >> { %539 = vmatpush3.bf16.msra.mxu0 %v505_v22 }
  0x28   : >> { %540 = vmatprep.subr.bf16.mxu0 %v713_v19 }
  0x2b   : >> { %541 = vmatpush3.bf16.msra.mxu0 %v506_v23 }
  0x2c   : >> { %542 = vmatprep.subr.bf16.mxu0 %v713_v19 }
  0x2f   : >> { %543 = vmatpush3.bf16.msra.mxu0 %v507_v24 }
  0x30   : >> { %544 = vmatprep.subr.bf16.mxu0 %v713_v19 }
  0x33   : >> { %545 = vmatpush3.bf16.msra.mxu0 %v508_v25 }
  0x34   : >> { %546 = vmatprep.subr.bf16.mxu0 %v713_v19 }
  0x37   : >> { %547 = vmatpush3.bf16.msra.mxu0 %v509_v26 }
  0x3a   : >> { %549 = vmatmul.mubr.bf16.vlgmr.msra.gmra.mrb[0].mxu0 %v235_v29 }
 0x10d   : >> { %v318_v30 = vpop.f32.mrb[0].mxu0 }
 0x10e   : >> { %v550_v31 = vpop.f32.mrb[1].mxu0 }
 0x10f   : >> { %v321_v32 = vpop.f32.mrb[2].mxu0 }
 0x110   : >> { %v325_v33 = vpack.c.bf16 %v321_v32, %v318_v30  ;;  %v551_v34 = vpop.f32.mrb[3].mxu0 }
 0x112   : >> { %553 = vmatpush3.bf16.msra.mxu1 %v325_v33 }
 0x115   : >> { %555 = vmatmul.mubr.msk.bf16.vlgmr.msra.gmra.mrb[0].mxu1 %vm331_vm1, %v510_v35 }
 0x1e5   : > { %229 = sbr.rel (!%p227_p12) target bundleno = 25 (0x19), region = 79 }
 0x1e8   : >> { %v369_v36 = vpop.f32.mrb[0].mxu1 }
 0x1e9   : >> { %377 = vst [vmem:[%s376_s30] sm:$0xff] %v369_v36  ;;  %v556_v37 = vpop.f32.mrb[1].mxu1 }
 0x1ea   : >> { %v372_v38 = vpop.f32.mrb[2].mxu1 }
 0x1eb   : >> { %378 = vst [vmem:[%s376_s30 + $0x8] sm:$0xff] %v372_v38  ;;  %v557_v39 = vpop.f32.mrb[3].mxu1 }
 0x1ec   : > { %638 = shalt.err (!%p635_p6)
}
 0x1ed   : > { %s639_s26 = scalar_lea.hbm %s920_s7, 1024  ;;  %s643_s19 = scalar_lea.hbm %s977_s3, 2048 }
 0x1ee   : > { %p640_p7 = scmp.ne.s32.totalorder %s920_s7, %s639_s26  ;;  %p644_p11 = scmp.lt.u32.totalorder %s920_s7, %s977_s3 }
 0x1ef   : > { %p645_p12 = scmp.lt.u32.totalorder %s643_s19, %s639_s26  ;;  %p647_p0 = scmp.lt.u32.totalorder %s639_s26, %s920_s7 }
 0x1f0   : > { %p641_p9 = pnand %p640_p7, %p778_p4 }
 0x1f1   : > { %p646_p13 = por %p645_p12, %p644_p11 }
 0x1f2   : > { %p642_p10 = pneg %p641_p9 }
 0x1f3   : > { %p648_p1 = por %p647_p0, %p646_p13 }
 0x1f5   : > { %p649_p2 = pnand %p648_p1, %p642_p10 }
 0x1f7   : > { %652 = shalt.err (!%p649_p2)
}
 0x1f8   : > { %s716_s28 = smov 128   ;;  %s717_s30 = smov 8  }
 0x1f9   : > { %558 = dma.vmem_to_hbm [thread:$0]  (%p778_p4), %s924_s8, 1024, %s920_s7, %s928_s9, %s716_s28, %s716_s28, %s717_s30  }
 0x1fa PF: > { %p564_p3 = scmp.ge.s32.totalorder %s707_s17, 2  ;;  %s410_s4 = sand.u32 1, %s687_s12  }
 0x1fb   : > { %s411_s27 = scalar_lea.sflag [#allocation3], %s410_s4 }
 0x1fc   : > { %p561_p5 = pnand %p564_p3, %p785_p8 }
 0x1fe   : > { %682 = dma.done.wait (!%p561_p5), %s411_s27, 1024  }
 0x1ff   : > { %684 = vsyncadd (!%p561_p5), %s411_s27, 4294966272  ;;  %s16_s17 = sadd.s32 1, %s707_s17   ;;  %s980_s12 = smov %s691_s13 }
 0x200   : > { %p13_p6 = scmp.ge.s32.totalorder %s16_s17, 4   ;;  %s981_s13 = smov %s695_s14 }
 0x201   : > { %s982_s14 = smov %s791_s25  ;;  %s983_s15 = smov %s703_s16 }
 0x202   : > { %s984_s16 = smov %s986_s20  ;;  %15 = sbr.rel (!%p13_p6) target bundleno = 4 (0x4), region = 90 }
 0x209   :  { %416 = vsyncpa [#allocation3], 1 }
 0x20a   :  { %418 = vsyncpa [#allocation3 + $0x1], 1 }

</bundles_post_ra>
